<compile_context>
chip_gen: v7x
topology: tpu7x:2x2x1
jax: 0.10.0
libtpu: 0.0.40
codegen_flags: <defaults>
</compile_context>

<pallas_src>
import math
from functools import partial

import numpy as np
import jax
import jax.numpy as jnp
from jax import lax
from jax.experimental import pallas as pl
from jax.experimental.pallas import tpu as pltpu

M = 8            # multiplicity of each irrep type (0e and 1e)
D = 4 * M        # 8 scalars + 3*8 vector components = 32
NG = 2 * M       # NormGate feature width (num_mul = 16)

# ---------------------------------------------------------------------------
# Tensor-product path normalization constants (e3nn conventions; Wigner-3j folded).
_NPATH = 5.0
_PW0 = math.sqrt(1.0 / _NPATH)
_PW1 = math.sqrt(3.0 / _NPATH)
_C0 = math.sqrt((1.0 / 2.0) * _PW0)
_C1 = math.sqrt((3.0 / 3.0) * _PW1)
K_SS0 = _C0                               # 0e x 0e -> 0e
K_VV0 = _C0 / math.sqrt(3.0)              # 1e x 1e -> 0e
K_SV1 = _C1 / math.sqrt(3.0)              # 0e x 1e -> 1e
K_VS1 = _C1 / math.sqrt(3.0)              # 1e x 0e -> 1e
K_VV1 = _C1 / math.sqrt(6.0)              # 1e x 1e -> 1e


# ---------------------------------------------------------------------------
# Pallas kernel: all intermediate math is feature-major [features, T] (nodes on the
# 128 lanes); the final o3.Linear_3 (with pin^T folded in) produces the e3nn
# node-major [T, 32] output block directly, so old_fii is added un-permuted and no
# wrapper back-permute pass over HBM is needed.
def _diag_kernel(x_ref, fii_ref, pin_ref,
                 ng12_w1_ref, ng12_b1_ref, ng12_w2_ref, ng12_b2_ref,
                 ng3_w1_ref, ng3_b1_ref, ng3_w2_ref, ng3_b2_ref,
                 lin12_w_ref, lin12_b_ref, lin3e_w_ref, lin3e_b_ref,
                 tpw_ref, out_ref):
    f32 = jnp.float32
    nt = (((1,), (1,)), ((), ()))          # contract minor dims of both operands

    # Fused layout conversion: e3nn mul-major [T, 32] block -> component-major
    # feature-major [32, T] via one MXU dot with a permutation matrix (exact).
    x = lax.dot_general(pin_ref[...], x_ref[...], nt, preferred_element_type=f32)

    T = x.shape[1]
    s, vx, vy, vz = x[0:M], x[M:2 * M], x[2 * M:3 * M], x[3 * M:4 * M]      # [8, T]

    # --- NormGate_1 & NormGate_2, fused: shared norm, stacked W1, block-diag W2.
    nrm = jnp.sqrt(vx * vx + vy * vy + vz * vz)                             # [8, T]
    f0 = jnp.concatenate([s, nrm], axis=0)                                  # [16, T]
    h = jnp.dot(ng12_w1_ref[...], f0, preferred_element_type=f32) + ng12_b1_ref[...]
    h = h * jax.nn.sigmoid(h)                                               # SiLU [32,T]
    g = jnp.dot(ng12_w2_ref[...], h, preferred_element_type=f32) + ng12_b2_ref[...]
    g1s, g1v = g[0:M], g[M:2 * M]              # branch 1 gates
    g2s, g2v = g[2 * M:3 * M], g[3 * M:4 * M]  # branch 2 gates

    # --- o3.Linear_1 & o3.Linear_2 fused: ONE [64,64] block-diag matmul on [64, T].
    z12 = jnp.concatenate([g1s, vx * g1v, vy * g1v, vz * g1v,
                           g2s, vx * g2v, vy * g2v, vz * g2v], axis=0)      # [64, T]
    z12 = jnp.dot(lin12_w_ref[...], z12, preferred_element_type=f32) + lin12_b_ref[...]
    z1, z2 = z12[0:D], z12[D:2 * D]
    ls, lvx, lvy, lvz = z1[0:M], z1[M:2 * M], z1[2 * M:3 * M], z1[3 * M:4 * M]
    rs, rvx, rvy, rvz = z2[0:M], z2[M:2 * M], z2[2 * M:3 * M], z2[3 * M:4 * M]

    # --- weighted 'uuu' tensor product (path constants folded into tpw host-side).
    # Broadcast each per-u weight across lanes ONCE (JAX does not CSE broadcasts).
    tpw = tpw_ref[...]                                                      # [40, 1]
    w_ss0 = jnp.broadcast_to(tpw[0:M], (M, T))
    w_sv1 = jnp.broadcast_to(tpw[M:2 * M], (M, T))
    w_vs1 = jnp.broadcast_to(tpw[2 * M:3 * M], (M, T))
    w_vv0 = jnp.broadcast_to(tpw[3 * M:4 * M], (M, T))
    w_vv1 = jnp.broadcast_to(tpw[4 * M:5 * M], (M, T))

    ts = w_ss0 * (ls * rs) + w_vv0 * (lvx * rvx + lvy * rvy + lvz * rvz)
    tvx = w_sv1 * (ls * rvx) + w_vs1 * (lvx * rs) + w_vv1 * (lvy * rvz - lvz * rvy)
    tvy = w_sv1 * (ls * rvy) + w_vs1 * (lvy * rs) + w_vv1 * (lvz * rvx - lvx * rvz)
    tvz = w_sv1 * (ls * rvz) + w_vs1 * (lvz * rs) + w_vv1 * (lvx * rvy - lvy * rvx)
    # resnet with old_x
    ts, tvx, tvy, tvz = ts + s, tvx + vx, tvy + vy, tvz + vz

    # --- output NormGate.
    nrm3 = jnp.sqrt(tvx * tvx + tvy * tvy + tvz * tvz)
    f3 = jnp.concatenate([ts, nrm3], axis=0)                                # [16, T]
    h3 = jnp.dot(ng3_w1_ref[...], f3, preferred_element_type=f32) + ng3_b1_ref[...]
    h3 = h3 * jax.nn.sigmoid(h3)
    g3 = jnp.dot(ng3_w2_ref[...], h3, preferred_element_type=f32) + ng3_b2_ref[...]
    g3s, g3v = g3[0:M], g3[M:2 * M]

    # --- o3.Linear_3 with pin^T folded in: produce the e3nn node-major [T, 32] block
    # directly, add old_fii un-permuted, single full-block store (no wrapper pass).
    z3 = jnp.concatenate([g3s, tvx * g3v, tvy * g3v, tvz * g3v], axis=0)    # [32, T]
    out = jnp.dot(z3.T, lin3e_w_ref[...], preferred_element_type=f32)       # [T, 32]
    out_ref[...] = out + lin3e_b_ref[...] + fii_ref[...]


# ---------------------------------------------------------------------------
# Host-side parameter fusion (plain JAX, tiny, runs inside the jitted wrapper).
def _block_diag(*blocks):
    n = sum(b.shape[0] for b in blocks)
    m = sum(b.shape[1] for b in blocks)
    out = jnp.zeros((n, m), blocks[0].dtype)
    r = c = 0
    for b in blocks:
        out = out.at[r:r + b.shape[0], c:c + b.shape[1]].set(b)
        r += b.shape[0]
        c += b.shape[1]
    return out


def _perm_matrix():
    # Row f (component-major feature) picks e3nn mul-major feature k.
    p = np.zeros((D, D), np.float32)
    for k in range(D):
        if k < M:
            f = k
        else:
            u, c = (k - M) // 3, (k - M) % 3
            f = M + c * M + u
        p[f, k] = 1.0
    return jnp.asarray(p)


def _prepare_kernel_params(p):
    ngw, ngb, linw, linb, tpw = p["ngw"], p["ngb"], p["linw"], p["linb"], p["tpw"]
    t = jnp.transpose                                             # [in,out] -> [out,in]
    # NormGate_1 & NormGate_2 fused FC: stacked W1 [32,16], block-diag W2 [32,32].
    ng12_w1 = jnp.concatenate([t(ngw[0, 0]), t(ngw[1, 0])], axis=0)
    ng12_b1 = jnp.concatenate([t(ngb[0, 0]), t(ngb[1, 0])], axis=0)         # [32, 1]
    ng12_w2 = _block_diag(t(ngw[0, 1]), t(ngw[1, 1]))
    ng12_b2 = jnp.concatenate([t(ngb[0, 1]), t(ngb[1, 1])], axis=0)
    # Output NormGate.
    ng3_w1, ng3_b1 = t(ngw[2, 0]), t(ngb[2, 0])
    ng3_w2, ng3_b2 = t(ngw[2, 1]), t(ngb[2, 1])
    # o3.Linear_k as block-diagonal [32,32] (bias on 0e rows only).
    lin_w, lin_b = [], []
    for k in range(3):
        ws, wv = t(linw[k, 0]), t(linw[k, 1])
        lin_w.append(_block_diag(ws, wv, wv, wv))
        lin_b.append(jnp.concatenate([t(linb[k]), jnp.zeros((3 * M, 1), jnp.float32)],
                                     axis=0))
    # o3.Linear_1 + o3.Linear_2 fused into one [64,64] block-diagonal weight.
    lin12_w = _block_diag(lin_w[0], lin_w[1])                               # [64, 64]
    lin12_b = jnp.concatenate([lin_b[0], lin_b[1]], axis=0)                 # [64, 1]
    # o3.Linear_3 with the component-major -> e3nn mul-major back-permute folded in
    # (pin is a 0/1 permutation matrix, so these dots are exact).
    pin = _perm_matrix()
    lin3e_w = jnp.dot(lin_w[2].T, pin)                                      # [32, 32]
    lin3e_b = jnp.dot(pin.T, lin_b[2]).T                                    # [1, 32]
    # TP weights with path constants folded, stored as [5*M, 1] (per-u, sublane axis).
    tpk = jnp.concatenate([K_SS0 * tpw[0], K_SV1 * tpw[1], K_VS1 * tpw[2],
                           K_VV0 * tpw[3], K_VV1 * tpw[4]], axis=0)         # [5, 8]
    tpk = tpk.reshape(5 * M, 1)
    return [pin, ng12_w1, ng12_b1, ng12_w2, ng12_b2,
            ng3_w1, ng3_b1, ng3_w2, ng3_b2,
            lin12_w, lin12_b, lin3e_w, lin3e_b, tpk]


def _pick_tile_n(n, max_tile=2048, target_steps=8):
    # Largest multiple-of-128 divisor of n (<= max_tile) giving >= target_steps grid
    # steps when possible (megacore sharding on v7x + DMA/compute overlap); else the
    # smallest such divisor (maximize step count for small n).
    divs = [t for t in range(128, min(max_tile, n) + 1, 128) if n % t == 0]
    if not divs:
        raise ValueError("n must have a multiple-of-128 divisor <= max_tile")
    good = [t for t in divs if n // t >= target_steps]
    return max(good) if good else min(divs)


@partial(jax.jit, static_argnames=("tile_n",))
def _diag_forward(x_e3nn, old_fii_e3nn, params, tile_n):
    n, d = x_e3nn.shape
    assert d == D
    assert tile_n % 128 == 0, "tile_n must be a multiple of 128 (nodes ride the lanes)"
    assert n % tile_n == 0, "n must be divisible by tile_n"
    kp = _prepare_kernel_params(params)

    def _param_spec(a):
        return pl.BlockSpec(a.shape, lambda i: (0,) * a.ndim)

    out = pl.pallas_call(
        _diag_kernel,
        out_shape=jax.ShapeDtypeStruct((n, D), jnp.float32),
        grid_spec=pltpu.PrefetchScalarGridSpec(
            num_scalar_prefetch=0,
            grid=(n // tile_n,),
            in_specs=[pl.BlockSpec((tile_n, D), lambda i: (i, 0)),
                      pl.BlockSpec((tile_n, D), lambda i: (i, 0))]
                     + [_param_spec(a) for a in kp],
            out_specs=pl.BlockSpec((tile_n, D), lambda i: (i, 0)),
        ),
        compiler_params=pltpu.CompilerParams(dimension_semantics=("parallel",)),
    )(x_e3nn, old_fii_e3nn, *kp)
    return out


def diag_layer_forward(x_e3nn, old_fii_e3nn, params, *, max_tile_n=2048):
    """x_e3nn, old_fii_e3nn: [N, 32] float32 in e3nn mul-major layout."""
    n = x_e3nn.shape[0]
    return _diag_forward(x_e3nn, old_fii_e3nn, params, _pick_tile_n(n, max_tile_n))


# ---------------------------------------------------------------------------
# Pure-JAX reference (independent node-major implementation; same math as the
# original module, full-precision matmuls) -- used only to validate the kernel.
_HI = jax.lax.Precision.HIGHEST


def _split_planes(z):
    return z[:, 0:M], z[:, M:2 * M], z[:, 2 * M:3 * M], z[:, 3 * M:4 * M]


def _norm_gate(s, vx, vy, vz, w1, b1, w2, b2):
    nrm = jnp.sqrt(vx * vx + vy * vy + vz * vz)
    h = (jnp.dot(s, w1[:M, :], precision=_HI)
         + jnp.dot(nrm, w1[M:, :], precision=_HI) + b1)
    h = h * jax.nn.sigmoid(h)
    g = jnp.dot(h, w2, precision=_HI) + b2
    gs, gv = g[:, :M], g[:, M:]
    return gs, vx * gv, vy * gv, vz * gv


def _irrep_linear(s, vx, vy, vz, ws, wv, b):
    dot = lambda a, w: jnp.dot(a, w, precision=_HI)
    return dot(s, ws) + b, dot(vx, wv), dot(vy, wv), dot(vz, wv)


def _tensor_product_uuu(ls, lvx, lvy, lvz, rs, rvx, rvy, rvz, tpw):
    w_ss0, w_sv1, w_vs1, w_vv0, w_vv1 = tpw[0], tpw[1], tpw[2], tpw[3], tpw[4]
    ts = (K_SS0 * w_ss0 * (ls * rs)
          + K_VV0 * w_vv0 * (lvx * rvx + lvy * rvy + lvz * rvz))
    tvx = (K_SV1 * w_sv1 * (ls * rvx) + K_VS1 * w_vs1 * (lvx * rs)
           + K_VV1 * w_vv1 * (lvy * rvz - lvz * rvy))
    tvy = (K_SV1 * w_sv1 * (ls * rvy) + K_VS1 * w_vs1 * (lvy * rs)
           + K_VV1 * w_vv1 * (lvz * rvx - lvx * rvz))
    tvz = (K_SV1 * w_sv1 * (ls * rvz) + K_VS1 * w_vs1 * (lvz * rs)
           + K_VV1 * w_vv1 * (lvx * rvy - lvy * rvx))
    return ts, tvx, tvy, tvz


def _forward_block(x, fii, ngw, ngb, linw, linb, tpw):
    s, vx, vy, vz = _split_planes(x)
    ls, lvx, lvy, lvz = _norm_gate(s, vx, vy, vz, ngw[0, 0], ngb[0, 0], ngw[0, 1], ngb[0, 1])
    ls, lvx, lvy, lvz = _irrep_linear(ls, lvx, lvy, lvz, linw[0, 0], linw[0, 1], linb[0])
    rs, rvx, rvy, rvz = _norm_gate(s, vx, vy, vz, ngw[1, 0], ngb[1, 0], ngw[1, 1], ngb[1, 1])
    rs, rvx, rvy, rvz = _irrep_linear(rs, rvx, rvy, rvz, linw[1, 0], linw[1, 1], linb[1])
    ts, tvx, tvy, tvz = _tensor_product_uuu(ls, lvx, lvy, lvz, rs, rvx, rvy, rvz, tpw)
    ts, tvx, tvy, tvz = ts + s, tvx + vx, tvy + vy, tvz + vz
    os_, ovx, ovy, ovz = _norm_gate(ts, tvx, tvy, tvz, ngw[2, 0], ngb[2, 0], ngw[2, 1], ngb[2, 1])
    os_, ovx, ovy, ovz = _irrep_linear(os_, ovx, ovy, ovz, linw[2, 0], linw[2, 1], linb[2])
    fs, fvx, fvy, fvz = _split_planes(fii)
    return os_ + fs, ovx + fvx, ovy + fvy, ovz + fvz


def _to_kernel_layout(x):            # reference-only: e3nn mul-major -> component-major
    s = x[:, :M]
    v = x[:, M:].reshape(-1, M, 3)
    v = jnp.transpose(v, (0, 2, 1)).reshape(-1, 3 * M)
    return jnp.concatenate([s, v], axis=-1)


def _from_kernel_layout(x):          # reference-only: component-major -> e3nn mul-major
    s = x[:, :M]
    v = x[:, M:].reshape(-1, 3, M)
    v = jnp.transpose(v, (0, 2, 1)).reshape(-1, 3 * M)
    return jnp.concatenate([s, v], axis=-1)


def reference_forward(x_e3nn, old_fii_e3nn, params):
    xk = _to_kernel_layout(x_e3nn)
    fk = _to_kernel_layout(old_fii_e3nn)
    outs = _forward_block(xk, fk, params["ngw"], params["ngb"],
                          params["linw"], params["linb"], params["tpw"])
    return _from_kernel_layout(jnp.concatenate(outs, axis=-1))


# ---------------------------------------------------------------------------
# Deterministic synthetic parameters (shapes match the module's __init__).
def init_params(key):
    k = jax.random.split(key, 5)
    ngw = jax.random.normal(k[0], (3, 2, NG, NG), jnp.float32) / math.sqrt(NG)
    ngb = 0.1 * jax.random.normal(k[1], (3, 2, 1, NG), jnp.float32)
    linw = jax.random.normal(k[2], (3, 2, M, M), jnp.float32) / math.sqrt(M)
    linb = 0.1 * jax.random.normal(k[3], (3, 1, M), jnp.float32)
    tpw = jax.random.normal(k[4], (5, 1, M), jnp.float32)
    return {"ngw": ngw, "ngb": ngb, "linw": linw, "linb": linb, "tpw": tpw}


if __name__ == "__main__":
    N = 1024
    key = jax.random.PRNGKey(0)
    kx, kf, kp = jax.random.split(key, 3)
    x = jax.random.normal(kx, (N, D), jnp.float32)          # e3nn layout "8x0e+8x1e"
    old_fii = jax.random.normal(kf, (N, D), jnp.float32)
    params = init_params(kp)

    out = diag_layer_forward(x, old_fii, params)            # grid >= 8 (megacore on v7x)
    out = jax.block_until_ready(out)

    ref = reference_forward(x, old_fii, params)
    assert out.shape == (N, D) and out.dtype == jnp.float32
    # Tolerance: the in-kernel f32 MXU dots may use reduced-precision passes; the
    # reference runs at Precision.HIGHEST so layout/fusion bugs (O(1) errors) are
    # not masked.  jnp.sqrt(0) is fine in forward; guard with eps if a VJP is added.
    if not bool(jnp.allclose(out, ref, atol=1e-2, rtol=1e-2)):
        raise AssertionError("Pallas kernel output mismatch vs JAX reference")
    print("KERNEL_OK")
</pallas_src>

<mosaic_0001>
module attributes {stable_mosaic.version = 11 : i64} {
  func.func @_diag_kernel(%arg0: i32, %arg1: memref<128x32xf32, #tpu.memory_space<vmem>>, %arg2: memref<128x32xf32, #tpu.memory_space<vmem>>, %arg3: memref<32x32xf32, #tpu.memory_space<vmem>>, %arg4: memref<32x16xf32, #tpu.memory_space<vmem>>, %arg5: memref<32x1xf32, #tpu.memory_space<vmem>>, %arg6: memref<32x32xf32, #tpu.memory_space<vmem>>, %arg7: memref<32x1xf32, #tpu.memory_space<vmem>>, %arg8: memref<16x16xf32, #tpu.memory_space<vmem>>, %arg9: memref<16x1xf32, #tpu.memory_space<vmem>>, %arg10: memref<16x16xf32, #tpu.memory_space<vmem>>, %arg11: memref<16x1xf32, #tpu.memory_space<vmem>>, %arg12: memref<64x64xf32, #tpu.memory_space<vmem>>, %arg13: memref<64x1xf32, #tpu.memory_space<vmem>>, %arg14: memref<32x32xf32, #tpu.memory_space<vmem>>, %arg15: memref<1x32xf32, #tpu.memory_space<vmem>>, %arg16: memref<40x1xf32, #tpu.memory_space<vmem>>, %arg17: memref<128x32xf32, #tpu.memory_space<vmem>>) attributes {dimension_semantics = [#tpu.dimension_semantics<parallel>], iteration_bounds = array<i64: 8>, scalar_prefetch = 0 : i64, scratch_operands = 0 : i64, tpu.core_type = #tpu.core_type<tc>, window_params = [{transform_indices = @transform_0, window_bounds = array<i64: 128, 32>}, {transform_indices = @transform_1, window_bounds = array<i64: 128, 32>}, {pipeline_mode = #tpu.pipeline_mode<synchronous>, transform_indices = @transform_2, window_bounds = array<i64: 32, 32>}, {pipeline_mode = #tpu.pipeline_mode<synchronous>, transform_indices = @transform_3, window_bounds = array<i64: 32, 16>}, {pipeline_mode = #tpu.pipeline_mode<synchronous>, transform_indices = @transform_4, window_bounds = array<i64: 32, 1>}, {pipeline_mode = #tpu.pipeline_mode<synchronous>, transform_indices = @transform_5, window_bounds = array<i64: 32, 32>}, {pipeline_mode = #tpu.pipeline_mode<synchronous>, transform_indices = @transform_6, window_bounds = array<i64: 32, 1>}, {pipeline_mode = #tpu.pipeline_mode<synchronous>, transform_indices = @transform_7, window_bounds = array<i64: 16, 16>}, {pipeline_mode = #tpu.pipeline_mode<synchronous>, transform_indices = @transform_8, window_bounds = array<i64: 16, 1>}, {pipeline_mode = #tpu.pipeline_mode<synchronous>, transform_indices = @transform_9, window_bounds = array<i64: 16, 16>}, {pipeline_mode = #tpu.pipeline_mode<synchronous>, transform_indices = @transform_10, window_bounds = array<i64: 16, 1>}, {pipeline_mode = #tpu.pipeline_mode<synchronous>, transform_indices = @transform_11, window_bounds = array<i64: 64, 64>}, {pipeline_mode = #tpu.pipeline_mode<synchronous>, transform_indices = @transform_12, window_bounds = array<i64: 64, 1>}, {pipeline_mode = #tpu.pipeline_mode<synchronous>, transform_indices = @transform_13, window_bounds = array<i64: 32, 32>}, {pipeline_mode = #tpu.pipeline_mode<synchronous>, transform_indices = @transform_14, window_bounds = array<i64: 1, 32>}, {pipeline_mode = #tpu.pipeline_mode<synchronous>, transform_indices = @transform_15, window_bounds = array<i64: 40, 1>}, {transform_indices = @transform_16, window_bounds = array<i64: 128, 32>}]} {
    %c0 = arith.constant 0 : index
    %c0_0 = arith.constant 0 : index
    %0 = vector.load %arg3[%c0, %c0_0] : memref<32x32xf32, #tpu.memory_space<vmem>>, vector<32x32xf32>
    %c0_1 = arith.constant 0 : index
    %c0_2 = arith.constant 0 : index
    %1 = vector.load %arg1[%c0_1, %c0_2] : memref<128x32xf32, #tpu.memory_space<vmem>>, vector<128x32xf32>
    %cst = arith.constant dense<0.000000e+00> : vector<32x128xf32>
    %2 = tpu.matmul %0, %1, %cst {dimension_numbers = #tpu.dot_dimension_numbers<[1], [1], [0], [0], [0, 0, 1, 0], [], []>} : vector<32x32xf32>, vector<128x32xf32>, vector<32x128xf32> -> vector<32x128xf32>
    %3 = vector.extract_strided_slice %2 {offsets = [0, 0], sizes = [8, 128], strides = [1, 1]} : vector<32x128xf32> to vector<8x128xf32>
    %4 = vector.extract_strided_slice %2 {offsets = [8, 0], sizes = [8, 128], strides = [1, 1]} : vector<32x128xf32> to vector<8x128xf32>
    %5 = vector.extract_strided_slice %2 {offsets = [16, 0], sizes = [8, 128], strides = [1, 1]} : vector<32x128xf32> to vector<8x128xf32>
    %6 = vector.extract_strided_slice %2 {offsets = [24, 0], sizes = [8, 128], strides = [1, 1]} : vector<32x128xf32> to vector<8x128xf32>
    %7 = arith.mulf %4, %4 : vector<8x128xf32>
    %8 = arith.mulf %5, %5 : vector<8x128xf32>
    %9 = arith.addf %7, %8 : vector<8x128xf32>
    %10 = arith.mulf %6, %6 : vector<8x128xf32>
    %11 = arith.addf %9, %10 : vector<8x128xf32>
    %12 = math.sqrt %11 : vector<8x128xf32>
    %13 = tpu.concatenate %3, %12 in 0 : vector<8x128xf32>, vector<8x128xf32> -> vector<16x128xf32>
    %c0_3 = arith.constant 0 : index
    %c0_4 = arith.constant 0 : index
    %14 = vector.load %arg4[%c0_3, %c0_4] : memref<32x16xf32, #tpu.memory_space<vmem>>, vector<32x16xf32>
    %cst_5 = arith.constant dense<0.000000e+00> : vector<32x128xf32>
    %15 = tpu.matmul %14, %13, %cst_5 {dimension_numbers = #tpu.dot_dimension_numbers<[1], [0], [0], [1], [0, 0, 1, 1], [], []>} : vector<32x16xf32>, vector<16x128xf32>, vector<32x128xf32> -> vector<32x128xf32>
    %c0_6 = arith.constant 0 : index
    %c0_7 = arith.constant 0 : index
    %16 = vector.load %arg5[%c0_6, %c0_7] : memref<32x1xf32, #tpu.memory_space<vmem>>, vector<32x1xf32>
    %17 = vector.broadcast %16 : vector<32x1xf32> to vector<32x128xf32>
    %18 = arith.addf %15, %17 : vector<32x128xf32>
    %19 = arith.negf %18 : vector<32x128xf32>
    %20 = math.exp %19 : vector<32x128xf32>
    %cst_8 = arith.constant 1.000000e+00 : f32
    %21 = vector.broadcast %cst_8 : f32 to vector<32x128xf32>
    %22 = arith.addf %21, %20 : vector<32x128xf32>
    %23 = arith.divf %21, %22 : vector<32x128xf32>
    %24 = arith.mulf %18, %23 : vector<32x128xf32>
    %c0_9 = arith.constant 0 : index
    %c0_10 = arith.constant 0 : index
    %25 = vector.load %arg6[%c0_9, %c0_10] : memref<32x32xf32, #tpu.memory_space<vmem>>, vector<32x32xf32>
    %cst_11 = arith.constant dense<0.000000e+00> : vector<32x128xf32>
    %26 = tpu.matmul %25, %24, %cst_11 {dimension_numbers = #tpu.dot_dimension_numbers<[1], [0], [0], [1], [0, 0, 1, 1], [], []>} : vector<32x32xf32>, vector<32x128xf32>, vector<32x128xf32> -> vector<32x128xf32>
    %c0_12 = arith.constant 0 : index
    %c0_13 = arith.constant 0 : index
    %27 = vector.load %arg7[%c0_12, %c0_13] : memref<32x1xf32, #tpu.memory_space<vmem>>, vector<32x1xf32>
    %28 = vector.broadcast %27 : vector<32x1xf32> to vector<32x128xf32>
    %29 = arith.addf %26, %28 : vector<32x128xf32>
    %30 = vector.extract_strided_slice %29 {offsets = [0, 0], sizes = [8, 128], strides = [1, 1]} : vector<32x128xf32> to vector<8x128xf32>
    %31 = vector.extract_strided_slice %29 {offsets = [8, 0], sizes = [8, 128], strides = [1, 1]} : vector<32x128xf32> to vector<8x128xf32>
    %32 = vector.extract_strided_slice %29 {offsets = [16, 0], sizes = [8, 128], strides = [1, 1]} : vector<32x128xf32> to vector<8x128xf32>
    %33 = vector.extract_strided_slice %29 {offsets = [24, 0], sizes = [8, 128], strides = [1, 1]} : vector<32x128xf32> to vector<8x128xf32>
    %34 = arith.mulf %4, %31 : vector<8x128xf32>
    %35 = arith.mulf %5, %31 : vector<8x128xf32>
    %36 = arith.mulf %6, %31 : vector<8x128xf32>
    %37 = arith.mulf %4, %33 : vector<8x128xf32>
    %38 = arith.mulf %5, %33 : vector<8x128xf32>
    %39 = arith.mulf %6, %33 : vector<8x128xf32>
    %40 = tpu.concatenate %30, %34, %35, %36, %32, %37, %38, %39 in 0 : vector<8x128xf32>, vector<8x128xf32>, vector<8x128xf32>, vector<8x128xf32>, vector<8x128xf32>, vector<8x128xf32>, vector<8x128xf32>, vector<8x128xf32> -> vector<64x128xf32>
    %c0_14 = arith.constant 0 : index
    %c0_15 = arith.constant 0 : index
    %41 = vector.load %arg12[%c0_14, %c0_15] : memref<64x64xf32, #tpu.memory_space<vmem>>, vector<64x64xf32>
    %cst_16 = arith.constant dense<0.000000e+00> : vector<64x128xf32>
    %42 = tpu.matmul %41, %40, %cst_16 {dimension_numbers = #tpu.dot_dimension_numbers<[1], [0], [0], [1], [0, 0, 1, 1], [], []>} : vector<64x64xf32>, vector<64x128xf32>, vector<64x128xf32> -> vector<64x128xf32>
    %c0_17 = arith.constant 0 : index
    %c0_18 = arith.constant 0 : index
    %43 = vector.load %arg13[%c0_17, %c0_18] : memref<64x1xf32, #tpu.memory_space<vmem>>, vector<64x1xf32>
    %44 = vector.broadcast %43 : vector<64x1xf32> to vector<64x128xf32>
    %45 = arith.addf %42, %44 : vector<64x128xf32>
    %46 = vector.extract_strided_slice %45 {offsets = [0, 0], sizes = [32, 128], strides = [1, 1]} : vector<64x128xf32> to vector<32x128xf32>
    %47 = vector.extract_strided_slice %45 {offsets = [32, 0], sizes = [32, 128], strides = [1, 1]} : vector<64x128xf32> to vector<32x128xf32>
    %48 = vector.extract_strided_slice %46 {offsets = [0, 0], sizes = [8, 128], strides = [1, 1]} : vector<32x128xf32> to vector<8x128xf32>
    %49 = vector.extract_strided_slice %46 {offsets = [8, 0], sizes = [8, 128], strides = [1, 1]} : vector<32x128xf32> to vector<8x128xf32>
    %50 = vector.extract_strided_slice %46 {offsets = [16, 0], sizes = [8, 128], strides = [1, 1]} : vector<32x128xf32> to vector<8x128xf32>
    %51 = vector.extract_strided_slice %46 {offsets = [24, 0], sizes = [8, 128], strides = [1, 1]} : vector<32x128xf32> to vector<8x128xf32>
    %52 = vector.extract_strided_slice %47 {offsets = [0, 0], sizes = [8, 128], strides = [1, 1]} : vector<32x128xf32> to vector<8x128xf32>
    %53 = vector.extract_strided_slice %47 {offsets = [8, 0], sizes = [8, 128], strides = [1, 1]} : vector<32x128xf32> to vector<8x128xf32>
    %54 = vector.extract_strided_slice %47 {offsets = [16, 0], sizes = [8, 128], strides = [1, 1]} : vector<32x128xf32> to vector<8x128xf32>
    %55 = vector.extract_strided_slice %47 {offsets = [24, 0], sizes = [8, 128], strides = [1, 1]} : vector<32x128xf32> to vector<8x128xf32>
    %c0_19 = arith.constant 0 : index
    %c0_20 = arith.constant 0 : index
    %56 = vector.load %arg16[%c0_19, %c0_20] : memref<40x1xf32, #tpu.memory_space<vmem>>, vector<40x1xf32>
    %57 = vector.extract_strided_slice %56 {offsets = [0, 0], sizes = [8, 1], strides = [1, 1]} : vector<40x1xf32> to vector<8x1xf32>
    %58 = vector.shape_cast %57 : vector<8x1xf32> to vector<8x1xf32>
    %59 = vector.broadcast %58 : vector<8x1xf32> to vector<8x128xf32>
    %60 = vector.extract_strided_slice %56 {offsets = [8, 0], sizes = [8, 1], strides = [1, 1]} : vector<40x1xf32> to vector<8x1xf32>
    %61 = vector.shape_cast %60 : vector<8x1xf32> to vector<8x1xf32>
    %62 = vector.broadcast %61 : vector<8x1xf32> to vector<8x128xf32>
    %63 = vector.extract_strided_slice %56 {offsets = [16, 0], sizes = [8, 1], strides = [1, 1]} : vector<40x1xf32> to vector<8x1xf32>
    %64 = vector.shape_cast %63 : vector<8x1xf32> to vector<8x1xf32>
    %65 = vector.broadcast %64 : vector<8x1xf32> to vector<8x128xf32>
    %66 = vector.extract_strided_slice %56 {offsets = [24, 0], sizes = [8, 1], strides = [1, 1]} : vector<40x1xf32> to vector<8x1xf32>
    %67 = vector.shape_cast %66 : vector<8x1xf32> to vector<8x1xf32>
    %68 = vector.broadcast %67 : vector<8x1xf32> to vector<8x128xf32>
    %69 = vector.extract_strided_slice %56 {offsets = [32, 0], sizes = [8, 1], strides = [1, 1]} : vector<40x1xf32> to vector<8x1xf32>
    %70 = vector.shape_cast %69 : vector<8x1xf32> to vector<8x1xf32>
    %71 = vector.broadcast %70 : vector<8x1xf32> to vector<8x128xf32>
    %72 = arith.mulf %48, %52 : vector<8x128xf32>
    %73 = arith.mulf %59, %72 : vector<8x128xf32>
    %74 = arith.mulf %49, %53 : vector<8x128xf32>
    %75 = arith.mulf %50, %54 : vector<8x128xf32>
    %76 = arith.addf %74, %75 : vector<8x128xf32>
    %77 = arith.mulf %51, %55 : vector<8x128xf32>
    %78 = arith.addf %76, %77 : vector<8x128xf32>
    %79 = arith.mulf %68, %78 : vector<8x128xf32>
    %80 = arith.addf %73, %79 : vector<8x128xf32>
    %81 = arith.mulf %48, %53 : vector<8x128xf32>
    %82 = arith.mulf %62, %81 : vector<8x128xf32>
    %83 = arith.mulf %49, %52 : vector<8x128xf32>
    %84 = arith.mulf %65, %83 : vector<8x128xf32>
    %85 = arith.addf %82, %84 : vector<8x128xf32>
    %86 = arith.mulf %50, %55 : vector<8x128xf32>
    %87 = arith.mulf %51, %54 : vector<8x128xf32>
    %88 = arith.subf %86, %87 : vector<8x128xf32>
    %89 = arith.mulf %71, %88 : vector<8x128xf32>
    %90 = arith.addf %85, %89 : vector<8x128xf32>
    %91 = arith.mulf %48, %54 : vector<8x128xf32>
    %92 = arith.mulf %62, %91 : vector<8x128xf32>
    %93 = arith.mulf %50, %52 : vector<8x128xf32>
    %94 = arith.mulf %65, %93 : vector<8x128xf32>
    %95 = arith.addf %92, %94 : vector<8x128xf32>
    %96 = arith.mulf %51, %53 : vector<8x128xf32>
    %97 = arith.mulf %49, %55 : vector<8x128xf32>
    %98 = arith.subf %96, %97 : vector<8x128xf32>
    %99 = arith.mulf %71, %98 : vector<8x128xf32>
    %100 = arith.addf %95, %99 : vector<8x128xf32>
    %101 = arith.mulf %48, %55 : vector<8x128xf32>
    %102 = arith.mulf %62, %101 : vector<8x128xf32>
    %103 = arith.mulf %51, %52 : vector<8x128xf32>
    %104 = arith.mulf %65, %103 : vector<8x128xf32>
    %105 = arith.addf %102, %104 : vector<8x128xf32>
    %106 = arith.mulf %49, %54 : vector<8x128xf32>
    %107 = arith.mulf %50, %53 : vector<8x128xf32>
    %108 = arith.subf %106, %107 : vector<8x128xf32>
    %109 = arith.mulf %71, %108 : vector<8x128xf32>
    %110 = arith.addf %105, %109 : vector<8x128xf32>
    %111 = arith.addf %80, %3 : vector<8x128xf32>
    %112 = arith.addf %90, %4 : vector<8x128xf32>
    %113 = arith.addf %100, %5 : vector<8x128xf32>
    %114 = arith.addf %110, %6 : vector<8x128xf32>
    %115 = arith.mulf %112, %112 : vector<8x128xf32>
    %116 = arith.mulf %113, %113 : vector<8x128xf32>
    %117 = arith.addf %115, %116 : vector<8x128xf32>
    %118 = arith.mulf %114, %114 : vector<8x128xf32>
    %119 = arith.addf %117, %118 : vector<8x128xf32>
    %120 = math.sqrt %119 : vector<8x128xf32>
    %121 = tpu.concatenate %111, %120 in 0 : vector<8x128xf32>, vector<8x128xf32> -> vector<16x128xf32>
    %c0_21 = arith.constant 0 : index
    %c0_22 = arith.constant 0 : index
    %122 = vector.load %arg8[%c0_21, %c0_22] : memref<16x16xf32, #tpu.memory_space<vmem>>, vector<16x16xf32>
    %cst_23 = arith.constant dense<0.000000e+00> : vector<16x128xf32>
    %123 = tpu.matmul %122, %121, %cst_23 {dimension_numbers = #tpu.dot_dimension_numbers<[1], [0], [0], [1], [0, 0, 1, 1], [], []>} : vector<16x16xf32>, vector<16x128xf32>, vector<16x128xf32> -> vector<16x128xf32>
    %c0_24 = arith.constant 0 : index
    %c0_25 = arith.constant 0 : index
    %124 = vector.load %arg9[%c0_24, %c0_25] : memref<16x1xf32, #tpu.memory_space<vmem>>, vector<16x1xf32>
    %125 = vector.broadcast %124 : vector<16x1xf32> to vector<16x128xf32>
    %126 = arith.addf %123, %125 : vector<16x128xf32>
    %127 = arith.negf %126 : vector<16x128xf32>
    %128 = math.exp %127 : vector<16x128xf32>
    %cst_26 = arith.constant 1.000000e+00 : f32
    %129 = vector.broadcast %cst_26 : f32 to vector<16x128xf32>
    %130 = arith.addf %129, %128 : vector<16x128xf32>
    %131 = arith.divf %129, %130 : vector<16x128xf32>
    %132 = arith.mulf %126, %131 : vector<16x128xf32>
    %c0_27 = arith.constant 0 : index
    %c0_28 = arith.constant 0 : index
    %133 = vector.load %arg10[%c0_27, %c0_28] : memref<16x16xf32, #tpu.memory_space<vmem>>, vector<16x16xf32>
    %cst_29 = arith.constant dense<0.000000e+00> : vector<16x128xf32>
    %134 = tpu.matmul %133, %132, %cst_29 {dimension_numbers = #tpu.dot_dimension_numbers<[1], [0], [0], [1], [0, 0, 1, 1], [], []>} : vector<16x16xf32>, vector<16x128xf32>, vector<16x128xf32> -> vector<16x128xf32>
    %c0_30 = arith.constant 0 : index
    %c0_31 = arith.constant 0 : index
    %135 = vector.load %arg11[%c0_30, %c0_31] : memref<16x1xf32, #tpu.memory_space<vmem>>, vector<16x1xf32>
    %136 = vector.broadcast %135 : vector<16x1xf32> to vector<16x128xf32>
    %137 = arith.addf %134, %136 : vector<16x128xf32>
    %138 = vector.extract_strided_slice %137 {offsets = [0, 0], sizes = [8, 128], strides = [1, 1]} : vector<16x128xf32> to vector<8x128xf32>
    %139 = vector.extract_strided_slice %137 {offsets = [8, 0], sizes = [8, 128], strides = [1, 1]} : vector<16x128xf32> to vector<8x128xf32>
    %140 = arith.mulf %112, %139 : vector<8x128xf32>
    %141 = arith.mulf %113, %139 : vector<8x128xf32>
    %142 = arith.mulf %114, %139 : vector<8x128xf32>
    %143 = tpu.concatenate %138, %140, %141, %142 in 0 : vector<8x128xf32>, vector<8x128xf32>, vector<8x128xf32>, vector<8x128xf32> -> vector<32x128xf32>
    %144 = tpu.transpose %143, [1, 0] : vector<32x128xf32> -> vector<128x32xf32>
    %c0_32 = arith.constant 0 : index
    %c0_33 = arith.constant 0 : index
    %145 = vector.load %arg14[%c0_32, %c0_33] : memref<32x32xf32, #tpu.memory_space<vmem>>, vector<32x32xf32>
    %cst_34 = arith.constant dense<0.000000e+00> : vector<128x32xf32>
    %146 = tpu.matmul %144, %145, %cst_34 {dimension_numbers = #tpu.dot_dimension_numbers<[1], [0], [0], [1], [0, 0, 1, 1], [], []>} : vector<128x32xf32>, vector<32x32xf32>, vector<128x32xf32> -> vector<128x32xf32>
    %c0_35 = arith.constant 0 : index
    %c0_36 = arith.constant 0 : index
    %147 = vector.load %arg15[%c0_35, %c0_36] : memref<1x32xf32, #tpu.memory_space<vmem>>, vector<1x32xf32>
    %148 = vector.broadcast %147 : vector<1x32xf32> to vector<128x32xf32>
    %149 = arith.addf %146, %148 : vector<128x32xf32>
    %c0_37 = arith.constant 0 : index
    %c0_38 = arith.constant 0 : index
    %150 = vector.load %arg2[%c0_37, %c0_38] : memref<128x32xf32, #tpu.memory_space<vmem>>, vector<128x32xf32>
    %151 = arith.addf %149, %150 : vector<128x32xf32>
    %c0_39 = arith.constant 0 : index
    %c0_40 = arith.constant 0 : index
    %152 = vector.load %arg17[%c0_39, %c0_40] : memref<128x32xf32, #tpu.memory_space<vmem>>, vector<128x32xf32>
    tpu.vector_store %arg17[%c0_39, %c0_40], %151 {strides = array<i32>} : memref<128x32xf32, #tpu.memory_space<vmem>>, vector<128x32xf32>,
    return
  }
  func.func @transform_0(%arg0: i32) -> (i32, i32) {
    %c0_i32 = arith.constant 0 : i32
    %c0_i32_0 = arith.constant 0 : i32
    return %arg0, %c0_i32 : i32, i32
  }
  func.func @transform_1(%arg0: i32) -> (i32, i32) {
    %c0_i32 = arith.constant 0 : i32
    %c0_i32_0 = arith.constant 0 : i32
    return %arg0, %c0_i32 : i32, i32
  }
  func.func @transform_2(%arg0: i32) -> (i32, i32) {
    %c0_i32 = arith.constant 0 : i32
    %c0_i32_0 = arith.constant 0 : i32
    %c0_i32_1 = arith.constant 0 : i32
    return %c0_i32, %c0_i32_0 : i32, i32
  }
  func.func @transform_3(%arg0: i32) -> (i32, i32) {
    %c0_i32 = arith.constant 0 : i32
    %c0_i32_0 = arith.constant 0 : i32
    %c0_i32_1 = arith.constant 0 : i32
    return %c0_i32, %c0_i32_0 : i32, i32
  }
  func.func @transform_4(%arg0: i32) -> (i32, i32) {
    %c0_i32 = arith.constant 0 : i32
    %c0_i32_0 = arith.constant 0 : i32
    %c0_i32_1 = arith.constant 0 : i32
    return %c0_i32, %c0_i32_0 : i32, i32
  }
  func.func @transform_5(%arg0: i32) -> (i32, i32) {
    %c0_i32 = arith.constant 0 : i32
    %c0_i32_0 = arith.constant 0 : i32
    %c0_i32_1 = arith.constant 0 : i32
    return %c0_i32, %c0_i32_0 : i32, i32
  }
  func.func @transform_6(%arg0: i32) -> (i32, i32) {
    %c0_i32 = arith.constant 0 : i32
    %c0_i32_0 = arith.constant 0 : i32
    %c0_i32_1 = arith.constant 0 : i32
    return %c0_i32, %c0_i32_0 : i32, i32
  }
  func.func @transform_7(%arg0: i32) -> (i32, i32) {
    %c0_i32 = arith.constant 0 : i32
    %c0_i32_0 = arith.constant 0 : i32
    %c0_i32_1 = arith.constant 0 : i32
    return %c0_i32, %c0_i32_0 : i32, i32
  }
  func.func @transform_8(%arg0: i32) -> (i32, i32) {
    %c0_i32 = arith.constant 0 : i32
    %c0_i32_0 = arith.constant 0 : i32
    %c0_i32_1 = arith.constant 0 : i32
    return %c0_i32, %c0_i32_0 : i32, i32
  }
  func.func @transform_9(%arg0: i32) -> (i32, i32) {
    %c0_i32 = arith.constant 0 : i32
    %c0_i32_0 = arith.constant 0 : i32
    %c0_i32_1 = arith.constant 0 : i32
    return %c0_i32, %c0_i32_0 : i32, i32
  }
  func.func @transform_10(%arg0: i32) -> (i32, i32) {
    %c0_i32 = arith.constant 0 : i32
    %c0_i32_0 = arith.constant 0 : i32
    %c0_i32_1 = arith.constant 0 : i32
    return %c0_i32, %c0_i32_0 : i32, i32
  }
  func.func @transform_11(%arg0: i32) -> (i32, i32) {
    %c0_i32 = arith.constant 0 : i32
    %c0_i32_0 = arith.constant 0 : i32
    %c0_i32_1 = arith.constant 0 : i32
    return %c0_i32, %c0_i32_0 : i32, i32
  }
  func.func @transform_12(%arg0: i32) -> (i32, i32) {
    %c0_i32 = arith.constant 0 : i32
    %c0_i32_0 = arith.constant 0 : i32
    %c0_i32_1 = arith.constant 0 : i32
    return %c0_i32, %c0_i32_0 : i32, i32
  }
  func.func @transform_13(%arg0: i32) -> (i32, i32) {
    %c0_i32 = arith.constant 0 : i32
    %c0_i32_0 = arith.constant 0 : i32
    %c0_i32_1 = arith.constant 0 : i32
    return %c0_i32, %c0_i32_0 : i32, i32
  }
  func.func @transform_14(%arg0: i32) -> (i32, i32) {
    %c0_i32 = arith.constant 0 : i32
    %c0_i32_0 = arith.constant 0 : i32
    %c0_i32_1 = arith.constant 0 : i32
    return %c0_i32, %c0_i32_0 : i32, i32
  }
  func.func @transform_15(%arg0: i32) -> (i32, i32) {
    %c0_i32 = arith.constant 0 : i32
    %c0_i32_0 = arith.constant 0 : i32
    %c0_i32_1 = arith.constant 0 : i32
    return %c0_i32, %c0_i32_0 : i32, i32
  }
  func.func @transform_16(%arg0: i32) -> (i32, i32) {
    %c0_i32 = arith.constant 0 : i32
    %c0_i32_0 = arith.constant 0 : i32
    return %arg0, %c0_i32 : i32, i32
  }
}

</mosaic_0001>

<bundles_post_ra>
// kernel: _diag_forward.1
= control target key start
LH: loop header
LB: loop body
LE: loop exit
PB: predicated region body
PF: predicated region fallthrough
CT: control target
= control target key end

     0   :  { %s2356_s21 = smov 0   ;;  %s2749_s0 = inlined_call_operand.vmem [shape: f32[1024,32], index: 0, kind: input, shape index: {}]   ;;  %s2750_s1 = inlined_call_operand.vmem [shape: f32[1024,32], index: 1, kind: input, shape index: {}]   ;;  %s2751_s2 = inlined_call_operand.vmem [shape: f32[32,32], index: 2, kind: input, shape index: {}]   ;;  %s2752_s3 = inlined_call_operand.vmem [shape: f32[32,16], index: 3, kind: input, shape index: {}]   ;;  %s2753_s4 = inlined_call_operand.vmem [shape: f32[32,1], index: 4, kind: input, shape index: {}]   ;;  %s2754_s5 = inlined_call_operand.vmem [shape: f32[32,32], index: 5, kind: input, shape index: {}]   ;;  %s2755_s6 = inlined_call_operand.vmem [shape: f32[32,1], index: 6, kind: input, shape index: {}]   ;;  %s2756_s7 = inlined_call_operand.vmem [shape: f32[16,16], index: 7, kind: input, shape index: {}]   ;;  %s2757_s8 = inlined_call_operand.vmem [shape: f32[16,1], index: 8, kind: input, shape index: {}]   ;;  %s2758_s9 = inlined_call_operand.vmem [shape: f32[16,16], index: 9, kind: input, shape index: {}]   ;;  %s2759_s10 = inlined_call_operand.vmem [shape: f32[16,1], index: 10, kind: input, shape index: {}]   ;;  %s2760_s11 = inlined_call_operand.vmem [shape: f32[64,64], index: 11, kind: input, shape index: {}]   ;;  %s2761_s12 = inlined_call_operand.vmem [shape: f32[64,1], index: 12, kind: input, shape index: {}]   ;;  %s2762_s13 = inlined_call_operand.vmem [shape: f32[32,32], index: 13, kind: input, shape index: {}]   ;;  %s2763_s14 = inlined_call_operand.vmem [shape: f32[1,32], index: 14, kind: input, shape index: {}]   ;;  %s2764_s15 = inlined_call_operand.vmem [shape: f32[40,1], index: 15, kind: input, shape index: {}]   ;;  %s2765_s16 = inlined_call_operand.vmem [shape: f32[1024,32], index: 16, kind: output, shape index: {}]  }
   0x1   :  { %2766 = sst [smem:[#allocation2_spill]] %s2749_s0 }
   0x2 LB: > { %s1840_s22 = sadd.s32 4294967295, %s2268_s21   ;;  %p1844_p0 = scmp.ge.s32.totalorder %s2268_s21, 1  ;;  %s2268_s21 = sphi %s2356_s21, %s26_s21  }
   0x3   : > { %p474_p1 = scmp.lt.s32.totalorder %s2268_s21, 9 }
   0x5   : > { %p475_p2 = pnand %p1844_p0, %p474_p1 }
   0x6   : > { %s1845_s23 = sshll.u32 (!%p475_p2), %s1840_s22, 4  ;;  %vm567_vm0 = vcmask (!%p475_p2), 261120   ;;  %v547_v0 = vld [vmem:[%s2751_s2] sm:$0xff] (!%p475_p2)  ;;  %s2767_s29 = sld [smem:[#allocation2_spill]] (!%p475_p2)  ;;  %v548_v26 = vld [vmem:[%s2751_s2 + $0x8] sm:$0xff] (!%p475_p2)  ;;  %v549_v27 = vld [vmem:[%s2751_s2 + $0x10] sm:$0xff] (!%p475_p2) }
   0x7   : > { %478 = sbr.rel (%p475_p2) target bundleno = 1950 (0x79e), region = 84  ;;  %p530_p3 = scmp.lt.s32.totalorder (!%p475_p2), %s1845_s23, 127  ;;  %2026 = vmatprep.mubr.msk.f32.mxu0 (!%p475_p2), %vm567_vm0, %v547_v0  ;;  %vm2378_vm1 = vmpackc.low (!%p475_p2), %vm567_vm0, %vm567_vm0  ;;  %v550_v28 = vld [vmem:[%s2751_s2 + $0x18] sm:$0xff] (!%p475_p2)  ;;  %v725_v29 = vld [vmem:[%s2752_s3] sm:$0xff] (!%p475_p2)  ;;  %vm753_vm2 = vcmask (!%p475_p2), 130048   ;;  %v2270_v32 = vmov (!%p475_p2), 0  }
   0x8   : > { %2036 = vmatprep.mubr.msk.f32.mxu1 (!%p475_p2), %vm753_vm2, %v725_v29  ;;  %v729_v30 = vld [vmem:[%s2753_s4] sm:$0xff] (!%p475_p2)  ;;  %v731_v31 = vld [vmem:[%s2753_s4 + $0x10] sm:$0xff] (!%p475_p2)  ;;  %2232 = vset.pattern.permute.xlu0 (!%p475_p2), %v2270_v32  ;;  %v730_v33 = vld [vmem:[%s2753_s4 + $0x8] sm:$0xff] (!%p475_p2)  ;;  %vm1066_vm5 = vcmask (!%p475_p2), 523264  }
   0x9   : > { %2233 = vset.pattern.permute.xlu1 (!%p475_p2), %v2270_v32  ;;  %735 = vperm.xlu0 (!%p475_p2), %2232, %v729_v30   ;;  %v732_v34 = vld [vmem:[%s2753_s4 + $0x18] sm:$0xff] (!%p475_p2)  ;;  %v884_v35 = vld [vmem:[%s2755_s6 + $0x8] sm:$0xff] (!%p475_p2)  ;;  %v883_v36 = vld [vmem:[%s2755_s6] sm:$0xff] (!%p475_p2) }
   0xa   : > { %745 = vperm.xlu1 (!%p475_p2), %2233, %v731_v31   ;;  %v886_v37 = vld [vmem:[%s2755_s6 + $0x18] sm:$0xff] (!%p475_p2)  ;;  %v885_v38 = vld [vmem:[%s2755_s6 + $0x10] sm:$0xff] (!%p475_p2)  ;;  %v1018_v39 = vld [vmem:[%s2761_s12] sm:$0xff] (!%p475_p2) }
   0xb   : > { %v1019_v40 = vld [vmem:[%s2761_s12 + $0x8] sm:$0xff] (!%p475_p2)  ;;  %v1020_v41 = vld [vmem:[%s2761_s12 + $0x10] sm:$0xff] (!%p475_p2)  ;;  %v1021_v42 = vld [vmem:[%s2761_s12 + $0x18] sm:$0xff] (!%p475_p2) }
   0xc   : > { %v1022_v43 = vld [vmem:[%s2761_s12 + $0x20] sm:$0xff] (!%p475_p2)  ;;  %v1023_v44 = vld [vmem:[%s2761_s12 + $0x28] sm:$0xff] (!%p475_p2)  ;;  %v1024_v45 = vld [vmem:[%s2761_s12 + $0x30] sm:$0xff] (!%p475_p2) }
   0xd   : > { %740 = vperm.xlu0 (!%p475_p2), %2232, %v730_v33   ;;  %v1025_v46 = vld [vmem:[%s2761_s12 + $0x38] sm:$0xff] (!%p475_p2)  ;;  %v1197_v47 = vld [vmem:[%s2764_s15 + $0x8] sm:$0xff] (!%p475_p2)  ;;  %v1198_v48 = vld [vmem:[%s2764_s15 + $0x10] sm:$0xff] (!%p475_p2) }
   0xe   : > { %s2771_s23 = smov (!%p530_p3, %s1845_s23), 127  ;;  %750 = vperm.xlu1 %2233, %v732_v34   ;;  %v1200_v49 = vld [vmem:[%s2764_s15 + $0x20] sm:$0xff]  ;;  %v1199_v51 = vld [vmem:[%s2764_s15 + $0x18] sm:$0xff]  ;;  %v1284_v53 = vld [vmem:[%s2757_s8 + $0x8] sm:$0xff] }
   0xf   : > { %s2368_s26 = sshll.u32 %s2771_s23, 3  ;;  %v1196_v50 = vld [vmem:[%s2764_s15] sm:$0xff]  ;;  %v1393_v55 = vld [vmem:[%s2759_s10 + $0x8] sm:$0xff] }
  0x10   : > { %s2374_s30 = scalar_lea.vmem %s2767_s29, %s2368_s26  ;;  %v1283_v52 = vld [vmem:[%s2757_s8] sm:$0xff]  ;;  %s2669_s18 = scalar_lea.vmem %s2750_s1, %s2368_s26 }
  0x11   : > { %v551_v2 = vld [vmem:[%s2374_s30] sm:$0xff]  ;;  %v552_v3 = vld [vmem:[%s2374_s30 + $0x8] sm:$0xff]  ;;  %v553_v4 = vld [vmem:[%s2374_s30 + $0x10] sm:$0xff]  ;;  %894 = vperm.xlu0 %2232, %v884_v35   ;;  %s2683_s24 = scalar_lea.vmem %s2765_s16, %s2368_s26 }
  0x12   : > { %v2130_v5 = vpack.c.bf16 %v552_v3, %v551_v2  ;;  %v554_v6 = vld [vmem:[%s2374_s30 + $0x18] sm:$0xff]  ;;  %v555_v8 = vld [vmem:[%s2374_s30 + $0x20] sm:$0xff]  ;;  %v556_v9 = vld [vmem:[%s2374_s30 + $0x28] sm:$0xff]  ;;  %889 = vperm.xlu1 %2233, %v883_v36  }
  0x13   : > { %v2136_v7 = vpack.c.bf16 %v554_v6, %v553_v4  ;;  %v2142_v10 = vpack.c.bf16 %v556_v9, %v555_v8  ;;  %v557_v11 = vld [vmem:[%s2374_s30 + $0x30] sm:$0xff]  ;;  %v558_v12 = vld [vmem:[%s2374_s30 + $0x38] sm:$0xff]  ;;  %v559_v14 = vld [vmem:[%s2374_s30 + $0x40] sm:$0xff] }
  0x14   : > { %2132 = vmatprep.subr.msk.bf16.mxu0 %vm2378_vm1, %v2130_v5  ;;  %v2148_v13 = vpack.c.bf16 %v558_v12, %v557_v11  ;;  %v560_v15 = vld [vmem:[%s2374_s30 + $0x48] sm:$0xff]  ;;  %v561_v17 = vld [vmem:[%s2374_s30 + $0x50] sm:$0xff]  ;;  %v562_v18 = vld [vmem:[%s2374_s30 + $0x58] sm:$0xff] }
  0x15   : > { %2135 = vmatpush3.bf16.xpose.msk.msra.mxu0 %vm2378_vm1, %v2130_v5  ;;  %v2154_v16 = vpack.c.bf16 %v560_v15, %v559_v14  ;;  %v2160_v19 = vpack.c.bf16 %v562_v18, %v561_v17  ;;  %v563_v20 = vld [vmem:[%s2374_s30 + $0x60] sm:$0xff]  ;;  %v564_v21 = vld [vmem:[%s2374_s30 + $0x68] sm:$0xff]  ;;  %v565_v23 = vld [vmem:[%s2374_s30 + $0x70] sm:$0xff]  ;;  %904 = vperm.xlu0 %2232, %v886_v37  }
  0x16   : > { %2138 = vmatprep.subr.msk.bf16.mxu0 %vm2378_vm1, %v2136_v7  ;;  %v2166_v22 = vpack.c.bf16 %v564_v21, %v563_v20  ;;  %v566_v24 = vld [vmem:[%s2374_s30 + $0x78] sm:$0xff]  ;;  %899 = vperm.xlu1 %2233, %v885_v38   ;;  %v1392_v54 = vld [vmem:[%s2759_s10] sm:$0xff]  ;;  %v727_v8 = vld [vmem:[%s2752_s3 + $0x10] sm:$0xff] }
  0x17   : > { %v2172_v25 = vpack.c.bf16 %v566_v24, %v565_v23  ;;  %v728_v9 = vld [vmem:[%s2752_s3 + $0x18] sm:$0xff] }
  0x19   : > { %1028 = vperm.xlu0 %2232, %v1018_v39  }
  0x1a   : > { %1033 = vperm.xlu1 %2233, %v1019_v40  }
  0x1d   : > { %2141 = vmatpush3.bf16.xpose.msk.msra.mxu0 %vm2378_vm1, %v2136_v7  ;;  %1038 = vperm.xlu0 %2232, %v1020_v41   ;;  %v726_v7 = vld [vmem:[%s2752_s3 + $0x8] sm:$0xff] }
  0x1e   : > { %2144 = vmatprep.subr.msk.bf16.mxu0 %vm2378_vm1, %v2142_v10  ;;  %1043 = vperm.xlu1 %2233, %v1021_v42  }
  0x21   : > { %1048 = vperm.xlu0 %2232, %v1022_v43  }
  0x22   : > { %1053 = vperm.xlu1 %2233, %v1023_v44  }
  0x25   : > { %2147 = vmatpush3.bf16.xpose.msk.msra.mxu0 %vm2378_vm1, %v2142_v10  ;;  %1058 = vperm.xlu0 %2232, %v1024_v45   ;;  %v879_v10 = vld [vmem:[%s2754_s5] sm:$0xff]  ;;  %v880_v45 = vld [vmem:[%s2754_s5 + $0x8] sm:$0xff] }
  0x26   : > { %2150 = vmatprep.subr.msk.bf16.mxu0 %vm2378_vm1, %v2148_v13  ;;  %1063 = vperm.xlu1 %2233, %v1025_v46   ;;  %v881_v46 = vld [vmem:[%s2754_s5 + $0x10] sm:$0xff] }
  0x29   : > { %1208 = vperm.xlu0 %2232, %v1197_v47   ;;  %v882_v47 = vld [vmem:[%s2754_s5 + $0x18] sm:$0xff] }
  0x2a   : > { %1213 = vperm.xlu1 %2233, %v1198_v48   ;;  %v1010_v48 = vld [vmem:[%s2760_s11] sm:$0xff] }
  0x2d   : > { %2153 = vmatpush3.bf16.xpose.msk.msra.mxu0 %vm2378_vm1, %v2148_v13  ;;  %1223 = vperm.xlu0 %2232, %v1200_v49  }
  0x2e   : > { %2156 = vmatprep.subr.msk.bf16.mxu0 %vm2378_vm1, %v2154_v16  ;;  %1203 = vperm.xlu1 %2233, %v1196_v50  }
  0x31   : > { %1218 = vperm.xlu0 %2232, %v1199_v51  }
  0x32   : > { %1287 = vperm.xlu1 %2233, %v1283_v52  }
  0x35   : > { %2159 = vmatpush3.bf16.xpose.msk.msra.mxu0 %vm2378_vm1, %v2154_v16  ;;  %1292 = vperm.xlu0 %2232, %v1284_v53  }
  0x36   : > { %2162 = vmatprep.subr.msk.bf16.mxu0 %vm2378_vm1, %v2160_v19  ;;  %1396 = vperm.xlu1 %2233, %v1392_v54  }
  0x39   : > { %1401 = vperm.xlu0 %2232, %v1393_v55  }
  0x3d   : > { %2165 = vmatpush3.bf16.xpose.msk.msra.mxu0 %vm2378_vm1, %v2160_v19 }
  0x3e   : > { %2168 = vmatprep.subr.msk.bf16.mxu0 %vm2378_vm1, %v2166_v22 }
  0x45   : > { %2171 = vmatpush3.bf16.xpose.msk.msra.mxu0 %vm2378_vm1, %v2166_v22 }
  0x46   : > { %2174 = vmatprep.subr.msk.bf16.mxu0 %vm2378_vm1, %v2172_v25 }
  0x4d   : > { %2177 = vmatpush3.bf16.xpose.msk.msra.mxu0 %vm2378_vm1, %v2172_v25 }
  0x54   : > { %2027 = vmatmul.mubr.msk.f32.vlgmr.msra.gmra.mrb[0].mxu0 %vm567_vm0, %v548_v26 }
  0x55   : > { %2029 = vmatprep.mubr.msk.f32.mxu0 %vm567_vm0, %v549_v27 }
  0x58   : > { %2030 = vmatmul.mubr.msk.f32.gmra.mrb[2].mxu0 %vm567_vm0, %v550_v28 }
  0x59   : > { %2050 = vmatprep.mubr.msk.f32.mxu0 %vm567_vm0, %v879_v10 }
  0x88   : > { %v736_v11 = vpop.permute.xlu0 %735 }
  0x89   : > { %v746_v12 = vpop.permute.xlu1 %745 }
  0x8c   : > { %v741_v13 = vpop.permute.xlu0 %740 }
  0x8d   : > { %v751_v19 = vpop.permute.xlu1 %750 }
  0x90   : > { %v895_v49 = vpop.permute.xlu0 %894 }
  0x91   : > { %v890_v50 = vpop.permute.xlu1 %889 }
 0x127   : > { %v2521_v56 = vpop.f32.mrb[0].mxu0 }
 0x128   : > { %v2523_v57 = vpop.f32.mrb[1].mxu0  ;;  %v713_v60 = vmul.f32 %v2521_v56, %v2521_v56 }
 0x12b   : > { %v2525_v58 = vpop.f32.mrb[2].mxu0 }
 0x12c   : > { %v2527_v59 = vpop.f32.mrb[3].mxu0  ;;  %v716_v62 = vmul.f32 %v2525_v58, %v2525_v58 }
 0x12d   : > { %v714_v61 = vmul.f32 %v2527_v59, %v2527_v59 }
 0x12f   : > { %v715_v63 = vadd.f32 %v714_v61, %v713_v60 }
 0x131   : > { %v717_v0 = vadd.f32 %v716_v62, %v715_v63  ;;  %v905_v62 = vpop.permute.xlu0 %904 }
 0x133   : > { %2234 = vrsqrt.f32 %v717_v0  ;;  %vm720_vm3 = vcmp.eq.f32.partialorder %v717_v0, inf  ;;  %v723_v3 = vand.u32 2147483648, %v717_v0  ;;  %vm722_vm4 = vcmp.eq.f32.partialorder %v717_v0, 0.0 }
 0x13d   : > { %v2235_v1 = vpop.eup %2234 }
 0x13e   : > { %v719_v2 = vmul.f32 %v2235_v1, %v717_v0 }
 0x140   : > { %v721_v4 = vsel %vm720_vm3, %v717_v0, %v719_v2  ;;  %v900_v0 = vpop.permute.xlu1 %899 }
 0x141   : > { %v724_v5 = vsel %vm722_vm4, %v723_v3, %v721_v4 }
 0x142   : > { %v2178_v6 = vpack.c.bf16 %v724_v5, %v2523_v57 }
 0x144   : > { %2179 = vmatprep.subr.bf16.mxu1 %v2178_v6 }
 0x145   : > { %2181 = vmatpush3.bf16.msra.mxu1 %v2178_v6 }
 0x148   : > { %2037 = vmatmul.mubr.msk.f32.vlgmr.msra.gmra.mrb[0].mxu1 %vm753_vm2, %v726_v7 }
 0x149   : > { %2039 = vmatprep.mubr.msk.f32.mxu1 %vm753_vm2, %v727_v8 }
 0x14c   : > { %2040 = vmatmul.mubr.msk.f32.gmra.mrb[2].mxu1 %vm753_vm2, %v728_v9 }
 0x14d   : > { %2072 = vmatprep.mubr.msk.f32.mxu1 %vm1066_vm5, %v1010_v48 }
 0x21b   : > { %v2038_v14 = vpop.f32.mrb[0].mxu1 }
 0x21c   : > { %v838_v15 = vadd.f32 %v2038_v14, %v741_v13  ;;  %v832_v16 = vpop.f32.mrb[1].mxu1  ;;  %v1013_v13 = vld [vmem:[%s2760_s11 + $0x18] sm:$0xff]  ;;  %v1014_v14 = vld [vmem:[%s2760_s11 + $0x20] sm:$0xff] }
 0x21d   : > { %v833_v17 = vadd.f32 %v832_v16, %v736_v11  ;;  %v1011_v11 = vld [vmem:[%s2760_s11 + $0x8] sm:$0xff]  ;;  %v1016_v16 = vld [vmem:[%s2760_s11 + $0x30] sm:$0xff] }
 0x21e   : > { %v1876_v18 = vmul.f32 -1.442695, %v838_v15 }
 0x21f   : > { %v1875_v20 = vmul.f32 -1.442695, %v833_v17  ;;  %v2041_v21 = vpop.f32.mrb[2].mxu1 }
 0x220   : > { %2236 = vpow2.f32 %v1876_v18  ;;  %v848_v22 = vadd.f32 %v2041_v21, %v751_v19  ;;  %v842_v23 = vpop.f32.mrb[3].mxu1  ;;  %v1281_v18 = vld [vmem:[%s2756_s7] sm:$0xff]  ;;  %v1029_v19 = vpop.permute.xlu0 %1028 }
 0x221   : > { %2238 = vpow2.f32 %v1875_v20  ;;  %v843_v24 = vadd.f32 %v842_v23, %v746_v12  ;;  %v1012_v12 = vld [vmem:[%s2760_s11 + $0x10] sm:$0xff]  ;;  %v1034_v20 = vpop.permute.xlu1 %1033 }
 0x222   : > { %v1878_v25 = vmul.f32 -1.442695, %v848_v22 }
 0x223   : > { %v1877_v26 = vmul.f32 -1.442695, %v843_v24 }
 0x224   : > { %2240 = vpow2.f32 %v1878_v25  ;;  %v1039_v21 = vpop.permute.xlu0 %1038 }
 0x225   : > { %2242 = vpow2.f32 %v1877_v26 }
 0x228   : > { %v1049_v23 = vpop.permute.xlu0 %1048 }
 0x22a   : > { %v2237_v27 = vpop.eup %2236 }
 0x22b   : > { %v2239_v28 = vpop.eup %2238  ;;  %v864_v29 = vadd.f32 1.0, %v2237_v27 }
 0x22c   : > { %v863_v30 = vadd.f32 1.0, %v2239_v28  ;;  %v1059_v27 = vpop.permute.xlu0 %1058 }
 0x22d   : > { %2244 = vrcp.f32 %v864_v29 }
 0x22e   : > { %v2241_v31 = vpop.eup %2240  ;;  %2246 = vrcp.f32 %v863_v30 }
 0x22f   : > { %v2243_v32 = vpop.eup %2242  ;;  %v866_v33 = vadd.f32 1.0, %v2241_v31 }
 0x230   : > { %v865_v34 = vadd.f32 1.0, %v2243_v32 }
 0x231   : > { %2248 = vrcp.f32 %v866_v33  ;;  %v1209_v33 = vpop.permute.xlu0 %1208 }
 0x232   : > { %2250 = vrcp.f32 %v865_v34 }
 0x237   : > { %v2245_v35 = vpop.eup %2244 }
 0x238   : > { %v2247_v36 = vpop.eup %2246  ;;  %v876_v37 = vmul.f32 %v2245_v35, %v838_v15  ;;  %v1015_v15 = vld [vmem:[%s2760_s11 + $0x28] sm:$0xff] }
 0x239   : > { %v875_v38 = vmul.f32 %v2247_v36, %v833_v17  ;;  %v1017_v17 = vld [vmem:[%s2760_s11 + $0x38] sm:$0xff] }
 0x23b   : > { %v2249_v39 = vpop.eup %2248  ;;  %v2182_v40 = vpack.c.bf16 %v876_v37, %v875_v38 }
 0x23c   : > { %v2251_v41 = vpop.eup %2250  ;;  %v878_v42 = vmul.f32 %v2249_v39, %v848_v22  ;;  %v1044_v22 = vpop.permute.xlu1 %1043 }
 0x23d   : > { %v877_v43 = vmul.f32 %v2251_v41, %v843_v24  ;;  %2183 = vmatprep.subr.bf16.mxu0 %v2182_v40 }
 0x23e   : > { %2185 = vmatpush3.bf16.msra.mxu0 %v2182_v40 }
 0x23f   : > { %v2186_v44 = vpack.c.bf16 %v878_v42, %v877_v43 }
 0x240   : > { %v1054_v25 = vpop.permute.xlu1 %1053 }
 0x241   : > { %2187 = vmatprep.subr.bf16.mxu0 %v2186_v44 }
 0x242   : > { %2189 = vmatpush3.bf16.msra.mxu0 %v2186_v44 }
 0x244   : > { %v1064_v30 = vpop.permute.xlu1 %1063 }
 0x245   : > { %2051 = vmatmul.mubr.msk.f32.vlgmr.msra.gmra.mrb[4].mxu0 %vm567_vm0, %v880_v45 }
 0x246   : > { %2053 = vmatprep.mubr.msk.f32.mxu0 %vm567_vm0, %v881_v46 }
 0x249   : > { %2054 = vmatmul.mubr.msk.f32.gmra.mrb[6].mxu0 %vm567_vm0, %v882_v47 }
 0x318   : > { %v2052_v51 = vpop.f32.mrb[4].mxu0 }
 0x319   : > { %v991_v52 = vadd.f32 %v2052_v51, %v895_v49  ;;  %v985_v53 = vpop.f32.mrb[5].mxu0  ;;  %v1214_v49 = vpop.permute.xlu1 %1213 }
 0x31a   : > { %v986_v54 = vadd.f32 %v985_v53, %v890_v50 }
 0x31b   : > { %v1005_v55 = vmul.f32 %v991_v52, %v2527_v59  ;;  %v1006_v60 = vmul.f32 %v2525_v58, %v991_v52  ;;  %v1004_v61 = vmul.f32 %v2521_v56, %v991_v52 }
 0x31c   : > { %v2055_v63 = vpop.f32.mrb[6].mxu0 }
 0x31d   : > { %v2190_v1 = vpack.c.bf16 %v1004_v61, %v986_v54  ;;  %v1001_v2 = vadd.f32 %v2055_v63, %v905_v62  ;;  %v995_v3 = vpop.f32.mrb[7].mxu0  ;;  %v2194_v4 = vpack.c.bf16 %v1006_v60, %v1005_v55  ;;  %v1224_v55 = vpop.permute.xlu0 %1223 }
 0x31e   : > { %v996_v5 = vadd.f32 %v995_v3, %v900_v0 }
 0x31f   : > { %v1008_v6 = vmul.f32 %v1001_v2, %v2527_v59  ;;  %v1009_v7 = vmul.f32 %v2525_v58, %v1001_v2  ;;  %v1007_v8 = vmul.f32 %v2521_v56, %v1001_v2  ;;  %2191 = vmatprep.subr.bf16.mxu1 %v2190_v1 }
 0x320   : > { %2193 = vmatpush3.bf16.msra.mxu1 %v2190_v1 }
 0x321   : > { %v2198_v9 = vpack.c.bf16 %v1007_v8, %v996_v5  ;;  %2195 = vmatprep.subr.bf16.mxu1 %v2194_v4  ;;  %v2202_v10 = vpack.c.bf16 %v1009_v7, %v1008_v6 }
 0x324   : > { %2197 = vmatpush3.bf16.msra.mxu1 %v2194_v4 }
 0x325   : > { %2199 = vmatprep.subr.bf16.mxu1 %v2198_v9 }
 0x328   : > { %2201 = vmatpush3.bf16.msra.mxu1 %v2198_v9 }
 0x329   : > { %2203 = vmatprep.subr.bf16.mxu1 %v2202_v10 }
 0x32c   : > { %2205 = vmatpush3.bf16.msra.mxu1 %v2202_v10 }
 0x32f   : > { %2073 = vmatmul.mubr.msk.f32.vlgmr.msra.gmra.mrb[4].mxu1 %vm1066_vm5, %v1011_v11 }
 0x330   : > { %2075 = vmatprep.mubr.msk.f32.mxu1 %vm1066_vm5, %v1012_v12 }
 0x333   : > { %2076 = vmatmul.mubr.msk.f32.gmra.mrb[6].mxu1 %vm1066_vm5, %v1013_v13 }
 0x334   : > { %2078 = vmatprep.mubr.msk.f32.mxu1 %vm1066_vm5, %v1014_v14 }
 0x337   : > { %2079 = vmatmul.mubr.msk.f32.gmra.mrb[8].mxu1 %vm1066_vm5, %v1015_v15 }
 0x338   : > { %2081 = vmatprep.mubr.msk.f32.mxu1 %vm1066_vm5, %v1016_v16 }
 0x33b   : > { %2082 = vmatmul.mubr.msk.f32.gmra.mrb[10].mxu1 %vm1066_vm5, %v1017_v17 }
 0x33c   : > { %2088 = vmatprep.mubr.msk.f32.mxu1 %vm753_vm2, %v1281_v18  ;;  %v1219_v18 = vpop.permute.xlu0 %1218 }
 0x402   : > { %v2074_v24 = vpop.f32.mrb[4].mxu1 }
 0x403   : > { %v1157_v26 = vpop.f32.mrb[5].mxu1  ;;  %v1163_v31 = vadd.f32 %v2074_v24, %v1034_v20 }
 0x404   : > { %v1158_v34 = vadd.f32 %v1157_v26, %v1029_v19  ;;  %v1204_v19 = vpop.permute.xlu1 %1203 }
 0x406   : > { %v2077_v28 = vpop.f32.mrb[6].mxu1 }
 0x407   : > { %v1167_v29 = vpop.f32.mrb[7].mxu1  ;;  %v1173_v35 = vadd.f32 %v2077_v28, %v1044_v22 }
 0x408   : > { %v1168_v36 = vadd.f32 %v1167_v29, %v1039_v21 }
 0x40a   : > { %v2080_v32 = vpop.f32.mrb[8].mxu1 }
 0x40b   : > { %v1183_v37 = vadd.f32 %v2080_v32, %v1054_v25  ;;  %v1177_v38 = vpop.f32.mrb[9].mxu1 }
 0x40c   : > { %v1178_v39 = vadd.f32 %v1177_v38, %v1049_v23 }
 0x40d   : > { %v1228_v40 = vmul.f32 %v1183_v37, %v1163_v31  ;;  %v1235_v41 = vmul.f32 %v1183_v37, %v1158_v34  ;;  %v1250_v42 = vmul.f32 %v1183_v37, %v1173_v35  ;;  %v1261_v43 = vmul.f32 %v1183_v37, %v1168_v36 }
 0x40e   : > { %v1226_v44 = vmul.f32 %v1178_v39, %v1158_v34  ;;  %v1237_v45 = vmul.f32 %v1178_v39, %v1163_v31  ;;  %v1247_v46 = vmul.f32 %v1178_v39, %v1168_v36  ;;  %v1257_v47 = vmul.f32 %v1178_v39, %v1173_v35  ;;  %v2083_v48 = vpop.f32.mrb[10].mxu1  ;;  %v1390_v39 = vld [vmem:[%s2758_s9] sm:$0xff] }
 0x40f   : > { %v1236_v50 = vmul.f32 %v1235_v41, %v1209_v33  ;;  %v1193_v51 = vadd.f32 %v2083_v48, %v1064_v30  ;;  %v1187_v52 = vpop.f32.mrb[11].mxu1 }
 0x410   : > { %v1238_v53 = vmul.f32 %v1237_v45, %v1214_v49  ;;  %v1188_v54 = vadd.f32 %v1187_v52, %v1059_v27  ;;  %v1258_v4 = vmul.f32 %v1257_v47, %v1214_v49  ;;  %v1248_v8 = vmul.f32 %v1247_v46, %v1214_v49 }
 0x411   : > { %v1231_v60 = vmul.f32 %v1193_v51, %v1173_v35  ;;  %v1240_v61 = vmul.f32 %v1193_v51, %v1168_v36  ;;  %v1251_v62 = vmul.f32 %v1193_v51, %v1163_v31  ;;  %v1255_v63 = vmul.f32 %v1193_v51, %v1158_v34 }
 0x412   : > { %v1239_v0 = vadd.f32 %v1238_v53, %v1236_v50  ;;  %v1229_v1 = vmul.f32 %v1188_v54, %v1168_v36  ;;  %v1241_v2 = vmul.f32 %v1188_v54, %v1173_v35  ;;  %v1245_v3 = vmul.f32 %v1188_v54, %v1158_v34 }
 0x413   : > { %v1252_v5 = vsub.f32 %v1250_v42, %v1251_v62  ;;  %v1256_v6 = vmul.f32 %v1255_v63, %v1209_v33  ;;  %v1260_v7 = vmul.f32 %v1188_v54, %v1163_v31  ;;  %v1227_v23 = vmul.f32 %v1226_v44, %v1204_v19  ;;  %v1288_v42 = vpop.permute.xlu1 %1287  ;;  %v1520_v62 = vld [vmem:[%s2762_s13] sm:$0xff]  ;;  %v1521_v63 = vld [vmem:[%s2762_s13 + $0x8] sm:$0xff] }
 0x414   : > { %v1230_v9 = vadd.f32 %v1229_v1, %v1228_v40  ;;  %v1242_v10 = vsub.f32 %v1240_v61, %v1241_v2  ;;  %v1246_v11 = vmul.f32 %v1245_v3, %v1209_v33  ;;  %v1293_v40 = vpop.permute.xlu0 %1292  ;;  %v1391_v61 = vld [vmem:[%s2758_s9 + $0x8] sm:$0xff] }
 0x415   : > { %v1253_v12 = vmul.f32 %v1252_v5, %v1224_v55  ;;  %v1259_v13 = vadd.f32 %v1258_v4, %v1256_v6  ;;  %v1262_v14 = vsub.f32 %v1260_v7, %v1261_v43  ;;  %v1522_v7 = vld [vmem:[%s2762_s13 + $0x10] sm:$0xff] }
 0x416   : > { %v1243_v15 = vmul.f32 %v1242_v10, %v1224_v55  ;;  %v1249_v16 = vadd.f32 %v1248_v8, %v1246_v11  ;;  %v1232_v17 = vadd.f32 %v1231_v60, %v1230_v9  ;;  %v1523_v8 = vld [vmem:[%s2762_s13 + $0x18] sm:$0xff] }
 0x417   : > { %v1263_v20 = vmul.f32 %v1262_v14, %v1224_v55  ;;  %v1397_v3 = vpop.permute.xlu1 %1396  ;;  %v2218_v9 = vpack.c.bf16 %v1523_v8, %v1522_v7  ;;  %v1735_v7 = vld [vmem:[%s2669_s18 + $0x58] sm:$0xff] }
 0x418   : > { %v1244_v21 = vadd.f32 %v1243_v15, %v1239_v0  ;;  %v1254_v22 = vadd.f32 %v1253_v12, %v1249_v16  ;;  %v1233_v24 = vmul.f32 %v1232_v17, %v1219_v18  ;;  %v2214_v0 = vpack.c.bf16 %v1521_v63, %v1520_v62  ;;  %v1402_v1 = vpop.permute.xlu0 %1401  ;;  %v1733_v63 = vld [vmem:[%s2669_s18 + $0x48] sm:$0xff] }
 0x419   : > { %v1264_v25 = vadd.f32 %v1263_v20, %v1259_v13 }
 0x41a   : > { %v2607_v26 = vadd.f32 %v2521_v56, %v1244_v21  ;;  %v2610_v27 = vadd.f32 %v1254_v22, %v2527_v59  ;;  %v1234_v28 = vadd.f32 %v1233_v24, %v1227_v23 }
 0x41b   : > { %v2613_v29 = vadd.f32 %v2525_v58, %v1264_v25 }
 0x41c   : > { %v1269_v30 = vmul.f32 %v2607_v26, %v2607_v26  ;;  %v1270_v31 = vmul.f32 %v2610_v27, %v2610_v27  ;;  %v1265_v32 = vadd.f32 %v1234_v28, %v2523_v57  ;;  %v1282_v57 = vld [vmem:[%s2756_s7 + $0x8] sm:$0xff] }
 0x41d   : > { %v1272_v56 = vmul.f32 %v2613_v29, %v2613_v29 }
 0x41e   : > { %v1271_v33 = vadd.f32 %v1270_v31, %v1269_v30  ;;  %v1725_v31 = vld [vmem:[%s2669_s18 + $0x8] sm:$0xff] }
 0x420   : > { %v1273_v34 = vadd.f32 %v1272_v56, %v1271_v33  ;;  %v1724_v56 = vld [vmem:[%s2669_s18] sm:$0xff] }
 0x422   : > { %2252 = vrsqrt.f32 %v1273_v34  ;;  %vm1276_vm6 = vcmp.eq.f32.partialorder %v1273_v34, inf  ;;  %v1279_v36 = vand.u32 2147483648, %v1273_v34  ;;  %vm1278_vm7 = vcmp.eq.f32.partialorder %v1273_v34, 0.0 }
 0x42c   : > { %v2253_v59 = vpop.eup %2252 }
 0x42d   : > { %v1275_v35 = vmul.f32 %v2253_v59, %v1273_v34 }
 0x42f   : > { %v1277_v58 = vsel %vm1276_vm6, %v1273_v34, %v1275_v35 }
 0x430   : > { %v1280_v37 = vsel %vm1278_vm7, %v1279_v36, %v1277_v58  ;;  %v1727_v58 = vld [vmem:[%s2669_s18 + $0x18] sm:$0xff] }
 0x431   : > { %v2206_v38 = vpack.c.bf16 %v1280_v37, %v1265_v32 }
 0x433   : > { %2207 = vmatprep.subr.bf16.mxu1 %v2206_v38 }
 0x434   : > { %2209 = vmatpush3.bf16.msra.mxu1 %v2206_v38 }
 0x437   : > { %2089 = vmatmul.mubr.msk.f32.vlgmr.msra.gmra.mrb[12].mxu1 %vm753_vm2, %v1282_v57  ;;  %v1726_v57 = vld [vmem:[%s2669_s18 + $0x10] sm:$0xff] }
 0x438   : > { %2095 = vmatprep.mubr.msk.f32.mxu1 %vm753_vm2, %v1390_v39 }
 0x50a   : > { %v2090_v41 = vpop.f32.mrb[12].mxu1 }
 0x50b   : > { %v1373_v43 = vadd.f32 %v2090_v41, %v1293_v40  ;;  %v1367_v44 = vpop.f32.mrb[13].mxu1 }
 0x50c   : > { %v1368_v45 = vadd.f32 %v1367_v44, %v1288_v42 }
 0x50d   : > { %v1894_v46 = vmul.f32 -1.442695, %v1373_v43 }
 0x50e   : > { %v1893_v47 = vmul.f32 -1.442695, %v1368_v45 }
 0x50f   : > { %2254 = vpow2.f32 %v1894_v46  ;;  %v1728_v46 = vld [vmem:[%s2669_s18 + $0x20] sm:$0xff] }
 0x510   : > { %2256 = vpow2.f32 %v1893_v47 }
 0x519   : > { %v2255_v48 = vpop.eup %2254 }
 0x51a   : > { %v2257_v49 = vpop.eup %2256  ;;  %v1383_v50 = vadd.f32 1.0, %v2255_v48 }
 0x51b   : > { %v1382_v51 = vadd.f32 1.0, %v2257_v49 }
 0x51c   : > { %2258 = vrcp.f32 %v1383_v50 }
 0x51d   : > { %2260 = vrcp.f32 %v1382_v51  ;;  %v1731_v51 = vld [vmem:[%s2669_s18 + $0x38] sm:$0xff] }
 0x526   : > { %v2259_v52 = vpop.eup %2258 }
 0x527   : > { %v2261_v53 = vpop.eup %2260  ;;  %v1389_v54 = vmul.f32 %v2259_v52, %v1373_v43  ;;  %v1729_v43 = vld [vmem:[%s2669_s18 + $0x28] sm:$0xff] }
 0x528   : > { %v1388_v55 = vmul.f32 %v2261_v53, %v1368_v45 }
 0x52a   : > { %v2210_v60 = vpack.c.bf16 %v1389_v54, %v1388_v55  ;;  %v1730_v54 = vld [vmem:[%s2669_s18 + $0x30] sm:$0xff] }
 0x52c   : > { %2211 = vmatprep.subr.bf16.mxu1 %v2210_v60 }
 0x52d   : > { %2213 = vmatpush3.bf16.msra.mxu1 %v2210_v60 }
 0x52e   : > { %2215 = vmatprep.subr.bf16.mxu1 %v2214_v0 }
 0x530   : > { %2096 = vmatmul.mubr.msk.f32.vlgmr.msra.gmra.mrb[14].mxu1 %vm753_vm2, %v1391_v61 }
 0x531   : > { %2217 = vmatpush3.bf16.msra.mxu1 %v2214_v0 }
 0x532   : > { %2219 = vmatprep.subr.bf16.mxu1 %v2218_v9 }
 0x535   : > { %2221 = vmatpush3.bf16.msra.mxu1 %v2218_v9 }
 0x603   : > { %v2097_v2 = vpop.f32.mrb[14].mxu1 }
 0x604   : > { %v1476_v4 = vpop.f32.mrb[15].mxu1  ;;  %v1482_v5 = vadd.f32 %v2097_v2, %v1402_v1  ;;  %v1732_v2 = vld [vmem:[%s2669_s18 + $0x40] sm:$0xff] }
 0x605   : > { %v1477_v6 = vadd.f32 %v1476_v4, %v1397_v3 }
 0x606   : > { %v1485_v10 = vmul.f32 %v1482_v5, %v2607_v26  ;;  %v1486_v11 = vmul.f32 %v1482_v5, %v2610_v27  ;;  %v1487_v12 = vmul.f32 %v1482_v5, %v2613_v29  ;;  %v2674_v29 = vld [vmem:[%s2763_s14] ss:$0 sm:$0xff] }
 0x607   : > { %1488 = vxpose.xlu1.b32.start [1/4] (short) %v1477_v6, 128 }
 0x60b   : > { %1489 = vxpose.xlu1.b32.cont [2/4] (short) %v1485_v10, 128  ;;  %v1734_v10 = vld [vmem:[%s2669_s18 + $0x50] sm:$0xff] }
 0x60f   : > { %1490 = vxpose.xlu1.b32.cont [3/4] (short) %v1486_v11, 128 }
 0x613   : > { %1491 = vxpose.xlu1.b32.end [4/4] (short) %v1487_v12, 128 }
 0x687   : > { %v1504_v13 = vpop.trf.xlu1 }
 0x688   : > { %2106 = vmatprep.mubr.msk.f32.mxu1 %vm567_vm0, %v1504_v13 }
 0x68b   : > { %v1505_v14 = vpop.trf.xlu1 }
 0x68c   : > { %2107 = vmatmul.mubr.msk.f32.vlgmr.msra.gmra.mrb[16].mxu1 %vm567_vm0, %v1505_v14 }
 0x68f   : > { %v1506_v15 = vpop.trf.xlu1 }
 0x690   : > { %2109 = vmatprep.mubr.msk.f32.mxu1 %vm567_vm0, %v1506_v15  ;;  %v1737_v15 = vld [vmem:[%s2669_s18 + $0x68] sm:$0xff] }
 0x693   : > { %v1507_v16 = vpop.trf.xlu1 }
 0x694   : > { %2110 = vmatmul.mubr.msk.f32.gmra.mrb[18].mxu1 %vm567_vm0, %v1507_v16 }
 0x697   : > { %v1508_v17 = vpop.trf.xlu1 }
 0x698   : > { %2112 = vmatprep.mubr.msk.f32.mxu1 %vm567_vm0, %v1508_v17 }
 0x69b   : > { %v1509_v18 = vpop.trf.xlu1 }
 0x69c   : > { %2113 = vmatmul.mubr.msk.f32.gmra.mrb[20].mxu1 %vm567_vm0, %v1509_v18  ;;  %v1736_v18 = vld [vmem:[%s2669_s18 + $0x60] sm:$0xff] }
 0x69f   : > { %v1510_v19 = vpop.trf.xlu1 }
 0x6a0   : > { %2115 = vmatprep.mubr.msk.f32.mxu1 %vm567_vm0, %v1510_v19 }
 0x6a3   : > { %v1511_v20 = vpop.trf.xlu1 }
 0x6a4   : > { %2116 = vmatmul.mubr.msk.f32.gmra.mrb[22].mxu1 %vm567_vm0, %v1511_v20 }
 0x6a7   : > { %v1512_v21 = vpop.trf.xlu1 }
 0x6a8   : > { %2118 = vmatprep.mubr.msk.f32.mxu1 %vm567_vm0, %v1512_v21 }
 0x6ab   : > { %v1513_v22 = vpop.trf.xlu1 }
 0x6ac   : > { %2119 = vmatmul.mubr.msk.f32.gmra.mrb[24].mxu1 %vm567_vm0, %v1513_v22 }
 0x6af   : > { %v1514_v23 = vpop.trf.xlu1 }
 0x6b0   : > { %2121 = vmatprep.mubr.msk.f32.mxu1 %vm567_vm0, %v1514_v23  ;;  %v1739_v23 = vld [vmem:[%s2669_s18 + $0x78] sm:$0xff] }
 0x6b3   : > { %v1515_v24 = vpop.trf.xlu1 }
 0x6b4   : > { %2122 = vmatmul.mubr.msk.f32.gmra.mrb[26].mxu1 %vm567_vm0, %v1515_v24 }
 0x6b7   : > { %v1516_v25 = vpop.trf.xlu1 }
 0x6b8   : > { %2124 = vmatprep.mubr.msk.f32.mxu1 %vm567_vm0, %v1516_v25 }
 0x6bb   : > { %v1517_v26 = vpop.trf.xlu1 }
 0x6bc   : > { %2125 = vmatmul.mubr.msk.f32.gmra.mrb[28].mxu1 %vm567_vm0, %v1517_v26  ;;  %v1738_v26 = vld [vmem:[%s2669_s18 + $0x70] sm:$0xff] }
 0x6bf   : > { %v1518_v27 = vpop.trf.xlu1 }
 0x6c0   : > { %2127 = vmatprep.mubr.msk.f32.mxu1 %vm567_vm0, %v1518_v27 }
 0x6c3   : > { %v1519_v28 = vpop.trf.xlu1 }
 0x6c4   : > { %2128 = vmatmul.mubr.msk.f32.gmra.mrb[30].mxu1 %vm567_vm0, %v1519_v28 }
 0x75f   : > { %v2108_v30 = vpop.f32.mrb[16].mxu1 }
 0x760   : > { %v1651_v32 = vadd.f32 %v2108_v30, %v2674_v29  ;;  %v1645_v33 = vpop.f32.mrb[17].mxu1 }
 0x761   : > { %v1646_v34 = vadd.f32 %v2674_v29, %v1645_v33 }
 0x762   : > { %v1741_v59 = vadd.f32 %v1725_v31, %v1651_v32 }
 0x763   : > { %v1740_v35 = vadd.f32 %v1724_v56, %v1646_v34 }
 0x764   : > { %1757 = vst.msk [vmem:[%s2683_s24 + $0x8] sm:$0xff] %vm567_vm0, %v1741_v59 }
 0x765   : > { %1756 = vst.msk [vmem:[%s2683_s24] sm:$0xff] %vm567_vm0, %v1740_v35 }
 0x767   : > { %v2111_v36 = vpop.f32.mrb[18].mxu1 }
 0x768   : > { %v1661_v37 = vadd.f32 %v2111_v36, %v2674_v29  ;;  %v1655_v38 = vpop.f32.mrb[19].mxu1 }
 0x769   : > { %v1656_v39 = vadd.f32 %v2674_v29, %v1655_v38 }
 0x76a   : > { %v1743_v40 = vadd.f32 %v1727_v58, %v1661_v37 }
 0x76b   : > { %v1742_v41 = vadd.f32 %v1726_v57, %v1656_v39 }
 0x76c   : > { %1759 = vst.msk [vmem:[%s2683_s24 + $0x18] sm:$0xff] %vm567_vm0, %v1743_v40 }
 0x76d   : > { %1758 = vst.msk [vmem:[%s2683_s24 + $0x10] sm:$0xff] %vm567_vm0, %v1742_v41 }
 0x76f   : > { %v2114_v42 = vpop.f32.mrb[20].mxu1 }
 0x770   : > { %v1671_v44 = vadd.f32 %v2114_v42, %v2674_v29  ;;  %v1665_v45 = vpop.f32.mrb[21].mxu1 }
 0x771   : > { %v1666_v47 = vadd.f32 %v2674_v29, %v1665_v45 }
 0x772   : > { %v1745_v48 = vadd.f32 %v1729_v43, %v1671_v44 }
 0x773   : > { %v1744_v49 = vadd.f32 %v1728_v46, %v1666_v47 }
 0x774   : > { %1761 = vst.msk [vmem:[%s2683_s24 + $0x28] sm:$0xff] %vm567_vm0, %v1745_v48 }
 0x775   : > { %1760 = vst.msk [vmem:[%s2683_s24 + $0x20] sm:$0xff] %vm567_vm0, %v1744_v49 }
 0x777   : > { %v2117_v50 = vpop.f32.mrb[22].mxu1 }
 0x778   : > { %v1681_v52 = vadd.f32 %v2117_v50, %v2674_v29  ;;  %v1675_v53 = vpop.f32.mrb[23].mxu1 }
 0x779   : > { %v1676_v55 = vadd.f32 %v2674_v29, %v1675_v53 }
 0x77a   : > { %v1747_v60 = vadd.f32 %v1731_v51, %v1681_v52 }
 0x77b   : > { %v1746_v61 = vadd.f32 %v1730_v54, %v1676_v55 }
 0x77c   : > { %1763 = vst.msk [vmem:[%s2683_s24 + $0x38] sm:$0xff] %vm567_vm0, %v1747_v60 }
 0x77d   : > { %1762 = vst.msk [vmem:[%s2683_s24 + $0x30] sm:$0xff] %vm567_vm0, %v1746_v61 }
 0x77f   : > { %v2120_v62 = vpop.f32.mrb[24].mxu1 }
 0x780   : > { %v1691_v0 = vadd.f32 %v2120_v62, %v2674_v29  ;;  %v1685_v1 = vpop.f32.mrb[25].mxu1 }
 0x781   : > { %v1686_v3 = vadd.f32 %v2674_v29, %v1685_v1 }
 0x782   : > { %v1749_v4 = vadd.f32 %v1733_v63, %v1691_v0 }
 0x783   : > { %v1748_v5 = vadd.f32 %v1732_v2, %v1686_v3 }
 0x784   : > { %1765 = vst.msk [vmem:[%s2683_s24 + $0x48] sm:$0xff] %vm567_vm0, %v1749_v4 }
 0x785   : > { %1764 = vst.msk [vmem:[%s2683_s24 + $0x40] sm:$0xff] %vm567_vm0, %v1748_v5 }
 0x787   : > { %v2123_v6 = vpop.f32.mrb[26].mxu1 }
 0x788   : > { %v1701_v8 = vadd.f32 %v2123_v6, %v2674_v29  ;;  %v1695_v9 = vpop.f32.mrb[27].mxu1 }
 0x789   : > { %v1696_v11 = vadd.f32 %v2674_v29, %v1695_v9 }
 0x78a   : > { %v1751_v12 = vadd.f32 %v1735_v7, %v1701_v8 }
 0x78b   : > { %v1750_v13 = vadd.f32 %v1734_v10, %v1696_v11 }
 0x78c   : > { %1767 = vst.msk [vmem:[%s2683_s24 + $0x58] sm:$0xff] %vm567_vm0, %v1751_v12 }
 0x78d   : > { %1766 = vst.msk [vmem:[%s2683_s24 + $0x50] sm:$0xff] %vm567_vm0, %v1750_v13 }
 0x78f   : > { %v2126_v14 = vpop.f32.mrb[28].mxu1 }
 0x790   : > { %v1711_v16 = vadd.f32 %v2126_v14, %v2674_v29  ;;  %v1705_v17 = vpop.f32.mrb[29].mxu1 }
 0x791   : > { %v1706_v19 = vadd.f32 %v2674_v29, %v1705_v17 }
 0x792   : > { %v1753_v20 = vadd.f32 %v1737_v15, %v1711_v16 }
 0x793   : > { %v1752_v21 = vadd.f32 %v1736_v18, %v1706_v19 }
 0x794   : > { %1769 = vst.msk [vmem:[%s2683_s24 + $0x68] sm:$0xff] %vm567_vm0, %v1753_v20 }
 0x795   : > { %1768 = vst.msk [vmem:[%s2683_s24 + $0x60] sm:$0xff] %vm567_vm0, %v1752_v21 }
 0x797   : > { %v2129_v22 = vpop.f32.mrb[30].mxu1 }
 0x798   : > { %v1721_v24 = vadd.f32 %v2129_v22, %v2674_v29  ;;  %v1715_v25 = vpop.f32.mrb[31].mxu1 }
 0x799   : > { %v1716_v27 = vadd.f32 %v2674_v29, %v1715_v25 }
 0x79a   : > { %v1755_v28 = vadd.f32 %v1739_v23, %v1721_v24 }
 0x79b   : > { %v1754_v30 = vadd.f32 %v1738_v26, %v1716_v27 }
 0x79c   : > { %1771 = vst.msk [vmem:[%s2683_s24 + $0x78] sm:$0xff] %vm567_vm0, %v1755_v28 }
 0x79d   : > { %1770 = vst.msk [vmem:[%s2683_s24 + $0x70] sm:$0xff] %vm567_vm0, %v1754_v30 }
 0x79e PF: > { %s26_s21 = sadd.s32 1, %s2268_s21  }
 0x79f   : > { %p23_p4 = scmp.ge.s32.totalorder %s26_s21, 10  }
 0x7a1   :  { %25 = sbr.rel (!%p23_p4) target bundleno = 2 (0x2), region = 117 }

</bundles_post_ra>
